<compile_context>
chip_gen: v7x
topology: tpu7x:2x2x1
jax: 0.10.0
libtpu: 0.0.40
codegen_flags: <defaults>
</compile_context>

<pallas_src>
import jax
import jax.numpy as jnp
from jax import lax
from jax.experimental import pallas as pl
from jax.experimental.pallas import tpu as pltpu

_LANE = 128                              # lane width: keep S tiles lane-dense
_TILE_TARGET_BYTES = 4 * 1024 * 1024     # ~4 MiB enc/tile -> 8 MiB double-buffered
_MAX_TILE_ROWS = 8192
_VMEM_LIMIT_BYTES = 48 * 1024 * 1024     # stay under v7x's 64 MiB physical VMEM


def _round_up(x, m):
    return ((x + m - 1) // m) * m


def _make_attn_kernel(S, S_pad, tile_S, num_s_tiles):
    """Kernel factory; S / S_pad / tile_S / num_s_tiles are static ints."""

    def kernel(h_ref, e_ref, o_ref):
        # h_ref: (B_tile, H) resident per batch block
        # e_ref: (tile_S, H) pipelined (double-buffered) enc tile
        # o_ref: (B_tile, S_pad) resident accumulator across the S axis
        si = pl.program_id(1)

        # Energies for this S-tile: contraction on the last axis of both
        # operands (trans_b on the MXU); enc.T is never materialized.
        # TODO(synk): if lowered MLIR ever shows a vxpose/relayout of the big
        # (tile_S, H) operand, restage hidden as (H, B) and use a (K, N) rhs.
        scores = lax.dot_general(
            h_ref[...], e_ref[...],
            dimension_numbers=(((1,), (1,)), ((), ())),
            preferred_element_type=jnp.float32,
        )
        start = pl.multiple_of(si * tile_S, tile_S)
        o_ref[:, pl.ds(start, tile_S)] = scores

        # Finalize on the last S tile: mask padded / ragged lanes to -inf and
        # apply the numerically stable softmax over the resident (B, S_pad) row.
        @pl.when(si == num_s_tiles - 1)
        def _():
            energies = o_ref[...]
            if S_pad > S:  # static: only emit the mask when padding exists
                col = lax.broadcasted_iota(jnp.int32, energies.shape, 1)
                energies = jnp.where(col < S, energies, -jnp.inf)
            m = jnp.max(energies, axis=-1, keepdims=True)
            ex = jnp.exp(energies - m)
            denom = jnp.sum(ex, axis=-1, keepdims=True)
            o_ref[...] = ex * pl.reciprocal(denom, approx=True)

    return kernel


def attn_scores(hidden_2d, enc_2d, *, max_tile_rows=None):
    """hidden_2d: (B, H), enc_2d: (S, H) -> softmax(hidden @ enc.T) as (B, S) f32."""
    B, H = hidden_2d.shape
    S, He = enc_2d.shape
    assert He == H, (He, H)

    # dtype policy: stream enc as-is when it is already bf16 (halves HBM bytes
    # of the dominant operand); otherwise compute in f32.  The MXU accumulates
    # in f32 either way and the softmax stays in f32.
    if enc_2d.dtype == jnp.bfloat16:
        compute_dtype = jnp.bfloat16
    else:
        compute_dtype = jnp.float32
        if enc_2d.dtype != jnp.float32:
            enc_2d = enc_2d.astype(jnp.float32)
    hidden_2d = hidden_2d.astype(compute_dtype)
    e_itemsize = jnp.dtype(compute_dtype).itemsize

    # S tiling: lane-dense (multiple-of-128) tiles of ~4 MiB of enc so the
    # per-step DMA dominates the ~0.35 us grid-step overhead.  The grid is
    # cdiv(S, tile_S); the ragged last block is masked inside the kernel, so
    # the encoder tensor is never padded/copied on the host side.
    rows = max(_LANE, (_TILE_TARGET_BYTES // max(1, H * e_itemsize)) // _LANE * _LANE)
    rows = min(rows, _MAX_TILE_ROWS)
    if max_tile_rows is not None:
        rows = max(_LANE, (min(rows, max_tile_rows) // _LANE) * _LANE)
    tile_S = min(rows, _round_up(S, _LANE))
    num_s_tiles = pl.cdiv(S, tile_S)
    S_pad = num_s_tiles * tile_S

    # Batch tiling: split B into two "parallel" blocks when cheap, so v7x's
    # second TensorCore gets used for batched queries (no-op for B == 1; on
    # v5e/v6e, 1 TC/chip, it is just a second loop step).
    if B >= 16 and B % 16 == 0:
        B_tile = B // 2
    else:
        B_tile = B
    num_b_blocks = B // B_tile

    # TODO(synk): H=32 (demo) streams a 32-lane-wide enc block (lane-sparse);
    # the reference model's H=256 is already lane-dense — pad H upstream if a
    # non-multiple-of-128 H is used at scale.

    kernel = _make_attn_kernel(S, S_pad, tile_S, num_s_tiles)
    cost = pl.CostEstimate(
        flops=2 * B * S * H,
        transcendentals=B * S_pad,
        bytes_accessed=(num_b_blocks * S * H * e_itemsize
                        + B * H * e_itemsize
                        + B * S_pad * 4),
    )

    out = pl.pallas_call(
        kernel,
        out_shape=jax.ShapeDtypeStruct((B, S_pad), jnp.float32),
        grid=(num_b_blocks, num_s_tiles),
        in_specs=[
            pl.BlockSpec((B_tile, H), lambda bi, si: (bi, 0)),   # query (resident per bi)
            pl.BlockSpec((tile_S, H), lambda bi, si: (si, 0)),   # enc tiles (pipelined)
        ],
        # Output block index is constant across the S axis -> resident
        # accumulator; the S axis is therefore "arbitrary", the batch axis
        # "parallel" (megacore sharding on v7x).
        out_specs=pl.BlockSpec((B_tile, S_pad), lambda bi, si: (bi, 0)),
        compiler_params=pltpu.CompilerParams(
            dimension_semantics=("parallel", "arbitrary"),
            vmem_limit_bytes=_VMEM_LIMIT_BYTES,
        ),
        cost_estimate=cost,
    )(hidden_2d, enc_2d)

    return out[:, :S]


def multiplicative_attn(hidden, encoder_outputs):
    """Module-equivalent forward.

    hidden: (1, H), encoder_outputs: (S, 1, H) -> (1, 1, S) f32
    (== F.softmax(energies).unsqueeze(0).unsqueeze(0)).
    """
    # TODO(synk): for tiny S (the S=8 demo) a plain XLA softmax(h @ e.T) would
    # beat the fixed pallas_call launch cost; kept on the kernel path here so
    # the kernel itself is exercised.
    S = encoder_outputs.shape[0]
    H = hidden.shape[-1]
    enc = encoder_outputs.reshape(S, H)
    scores = attn_scores(hidden.reshape(1, H), enc)
    return scores.reshape(1, 1, S)


def init_params(key, hidden_size):
    """Deterministic init of the module's parameters (nn.Linear(H, H))."""
    kw, kb = jax.random.split(key)
    bound = 1.0 / (hidden_size ** 0.5)
    attn_w = jax.random.uniform(kw, (hidden_size, hidden_size),
                                minval=-bound, maxval=bound, dtype=jnp.float32)
    attn_b = jax.random.uniform(kb, (hidden_size,),
                                minval=-bound, maxval=bound, dtype=jnp.float32)
    # TODO(synk): self.attn is never used in the reference forward()/score();
    # kept only to mirror the module's parameter set.
    return {"attn_w": attn_w, "attn_b": attn_b}


def reference_scores(hidden_2d, enc_2d):
    energies = hidden_2d @ enc_2d.T
    return jax.nn.softmax(energies, axis=-1)


if __name__ == "__main__":
    hidden_size = 32   # small H consistent with the harness (reference model uses 256)
    seq_len = 8

    key = jax.random.PRNGKey(0)
    k_p, k_h, k_e, k_h2, k_e2, k_h3, k_e3 = jax.random.split(key, 7)

    params = init_params(k_p, hidden_size)  # unused in forward, mirrors module

    # Tolerances are loosened slightly because the finalize uses the EUP
    # approximate reciprocal (weights may not sum to exactly 1.0).
    ATOL = RTOL = 2e-3

    # 1) Module-shaped case: hidden (1, H), encoder_outputs (S, 1, H) -> (1, 1, S).
    hidden = jax.random.normal(k_h, (1, hidden_size), dtype=jnp.float32)
    encoder_outputs = jax.random.normal(k_e, (seq_len, 1, hidden_size),
                                        dtype=jnp.float32)
    out = jax.block_until_ready(multiplicative_attn(hidden, encoder_outputs))
    ref = reference_scores(hidden,
                           encoder_outputs.reshape(seq_len, hidden_size)
                           ).reshape(1, 1, seq_len)
    assert out.shape == (1, 1, seq_len), out.shape
    assert jnp.allclose(out, ref, atol=ATOL, rtol=RTOL)

    # 2) Multi-tile S path (ragged last enc block, padded-lane masking) plus a
    #    2-block "parallel" batch axis of the same kernel.
    B2, S2 = 16, 600
    hidden2 = jax.random.normal(k_h2, (B2, hidden_size), dtype=jnp.float32)
    enc2 = jax.random.normal(k_e2, (S2, hidden_size), dtype=jnp.float32)
    out2 = jax.block_until_ready(attn_scores(hidden2, enc2, max_tile_rows=256))
    ref2 = reference_scores(hidden2, enc2)
    assert out2.shape == (B2, S2), out2.shape
    assert jnp.allclose(out2, ref2, atol=ATOL, rtol=RTOL)

    # 3) bf16 streaming path (enc kept in bf16, f32 MXU accumulate + f32 softmax).
    B3, S3 = 2, 200
    hidden3 = jax.random.normal(k_h3, (B3, hidden_size),
                                dtype=jnp.float32).astype(jnp.bfloat16)
    enc3 = jax.random.normal(k_e3, (S3, hidden_size),
                             dtype=jnp.float32).astype(jnp.bfloat16)
    out3 = jax.block_until_ready(attn_scores(hidden3, enc3))
    ref3 = reference_scores(hidden3.astype(jnp.float32), enc3.astype(jnp.float32))
    assert out3.shape == (B3, S3), out3.shape
    assert jnp.allclose(out3, ref3, atol=ATOL, rtol=RTOL)

    print("KERNEL_OK")
</pallas_src>

<mosaic_0001>
module attributes {stable_mosaic.version = 11 : i64} {
  func.func @kernel(%arg0: i32, %arg1: i32, %arg2: memref<1x32xf32, #tpu.memory_space<vmem>>, %arg3: memref<128x32xf32, #tpu.memory_space<vmem>>, %arg4: memref<1x128xf32, #tpu.memory_space<vmem>>) attributes {dimension_semantics = [#tpu.dimension_semantics<parallel>, #tpu.dimension_semantics<arbitrary>], iteration_bounds = array<i64: 1, 1>, scalar_prefetch = 0 : i64, scratch_operands = 0 : i64, tpu.core_type = #tpu.core_type<tc>, window_params = [{transform_indices = @transform_0, window_bounds = array<i64: 1, 32>}, {transform_indices = @transform_1, window_bounds = array<i64: 128, 32>}, {transform_indices = @transform_2, window_bounds = array<i64: 1, 128>}]} {
    %c0 = arith.constant 0 : index
    %c0_0 = arith.constant 0 : index
    %0 = vector.load %arg2[%c0, %c0_0] : memref<1x32xf32, #tpu.memory_space<vmem>>, vector<1x32xf32>
    %c0_1 = arith.constant 0 : index
    %c0_2 = arith.constant 0 : index
    %1 = vector.load %arg3[%c0_1, %c0_2] : memref<128x32xf32, #tpu.memory_space<vmem>>, vector<128x32xf32>
    %cst = arith.constant dense<0.000000e+00> : vector<1x128xf32>
    %2 = tpu.matmul %0, %1, %cst {dimension_numbers = #tpu.dot_dimension_numbers<[1], [1], [0], [0], [0, 0, 1, 0], [], []>} : vector<1x32xf32>, vector<128x32xf32>, vector<1x128xf32> -> vector<1x128xf32>
    %c128_i32 = arith.constant 128 : i32
    %3 = arith.muli %arg1, %c128_i32 : i32
    %4 = tpu.assume_multiple %3, 128 : i32
    %c0_3 = arith.constant 0 : index
    %5 = arith.index_cast %4 : i32 to index
    %6 = vector.load %arg4[%c0_3, %5] : memref<1x128xf32, #tpu.memory_space<vmem>>, vector<1x128xf32>
    tpu.vector_store %arg4[%c0_3, %5], %2 {strides = array<i32>} : memref<1x128xf32, #tpu.memory_space<vmem>>, vector<1x128xf32>,
    %c0_i32 = arith.constant 0 : i32
    %7 = arith.cmpi eq, %arg1, %c0_i32 : i32
    %8 = arith.extui %7 : i1 to i32
    %c0_i32_4 = arith.constant 0 : i32
    %9 = arith.cmpi ne, %8, %c0_i32_4 : i32
    scf.if %9 {
      %c0_5 = arith.constant 0 : index
      %c0_6 = arith.constant 0 : index
      %10 = vector.load %arg4[%c0_5, %c0_6] : memref<1x128xf32, #tpu.memory_space<vmem>>, vector<1x128xf32>
      %11 = tpu.iota {dimensions = array<i32: 1>} : vector<1x128xi32>
      %c8_i32 = arith.constant 8 : i32
      %12 = vector.broadcast %c8_i32 : i32 to vector<1x128xi32>
      %13 = arith.cmpi slt, %11, %12 : vector<1x128xi32>
      %cst_7 = arith.constant 0xFF800000 : f32
      %14 = vector.broadcast %cst_7 : f32 to vector<1x128xf32>
      %15 = arith.select %13, %10, %14 : vector<1x128xi1>, vector<1x128xf32>
      %cst_8 = arith.constant dense<0xFF800000> : vector<1xf32>
      %16 = vector.multi_reduction <maximumf>, %15, %cst_8 [1] : vector<1x128xf32> to vector<1xf32>
      %17 = vector.shape_cast %16 : vector<1xf32> to vector<1x1xf32>
      %18 = vector.broadcast %17 : vector<1x1xf32> to vector<1x128xf32>
      %19 = arith.subf %15, %18 : vector<1x128xf32>
      %20 = math.exp %19 : vector<1x128xf32>
      %cst_9 = arith.constant dense<0.000000e+00> : vector<1xf32>
      %21 = vector.multi_reduction <add>, %20, %cst_9 [1] : vector<1x128xf32> to vector<1xf32>
      %22 = vector.shape_cast %21 : vector<1xf32> to vector<1x1xf32>
      %23 = tpu.reciprocal %22 {approx = true} : vector<1x1xf32> -> vector<1x1xf32>
      %24 = vector.broadcast %23 : vector<1x1xf32> to vector<1x128xf32>
      %25 = arith.mulf %20, %24 : vector<1x128xf32>
      %c0_10 = arith.constant 0 : index
      %c0_11 = arith.constant 0 : index
      %26 = vector.load %arg4[%c0_10, %c0_11] : memref<1x128xf32, #tpu.memory_space<vmem>>, vector<1x128xf32>
      tpu.vector_store %arg4[%c0_10, %c0_11], %25 {strides = array<i32>} : memref<1x128xf32, #tpu.memory_space<vmem>>, vector<1x128xf32>,
    } else {
    }
    return
  }
  func.func @transform_0(%arg0: i32, %arg1: i32) -> (i32, i32) {
    %c0_i32 = arith.constant 0 : i32
    %c0_i32_0 = arith.constant 0 : i32
    return %arg0, %c0_i32 : i32, i32
  }
  func.func @transform_1(%arg0: i32, %arg1: i32) -> (i32, i32) {
    %c0_i32 = arith.constant 0 : i32
    %c0_i32_0 = arith.constant 0 : i32
    return %arg1, %c0_i32 : i32, i32
  }
  func.func @transform_2(%arg0: i32, %arg1: i32) -> (i32, i32) {
    %c0_i32 = arith.constant 0 : i32
    %c0_i32_0 = arith.constant 0 : i32
    return %arg0, %c0_i32 : i32, i32
  }
}

</mosaic_0001>

<bundles_post_ra>
// kernel: tpu_custom_call.1
= control target key start
LH: loop header
LB: loop body
LE: loop exit
PB: predicated region body
PF: predicated region fallthrough
CT: control target
= control target key end

     0   :  { %7 = vsyncpa [#allocation3], 0  ;;  %s488_s0 = inlined_call_operand.hbm [shape: f32[1,32], index: 0, kind: input, shape index: {}]   ;;  %s489_s1 = inlined_call_operand.hbm [shape: f32[8,32], index: 1, kind: input, shape index: {}]   ;;  %s490_s2 = inlined_call_operand.hbm [shape: f32[1,128], index: 2, kind: output, shape index: {}]  }
   0x1   :  { %8 = vsyncpa [#allocation6], 0 }
   0x2   :  { %9 = vsyncpa [#allocation4], 0  ;;  %s406_s9 = smov [#allocation2]   ;;  %s334_s13 = scalar_lea.hbm %s488_s0, 16 }
   0x3   :  { %s16_s10 = sshll.u32 %s406_s9, 4  ;;  %p335_p0 = scmp.ne.s32.totalorder %s488_s0, %s334_s13  ;;  %s17_s10 = int_to_ptr.vmem [resolvable:$true] %s16_s10 }
   0x4   :  { %p338_p1 = scmp.lt.u32.totalorder %s334_s13, %s488_s0 }
   0x6   :  { %p340_p2 = pnand %p338_p1, %p335_p0 }
   0x8   :  { %343 = shalt.err (!%p340_p2)
}
   0x9   :  { %s344_s18 = scalar_lea.vmem %s17_s10, 16  ;;  %s348_s19 = scalar_lea.vmem %s17_s10, 32 }
   0xa   :  { %p345_p3 = scmp.ne.s32.totalorder %s17_s10, %s344_s18  ;;  %p349_p4 = scmp.lt.s32.totalorder %s17_s10, %s17_s10 }
   0xb   :  { %p350_p5 = scmp.lt.s32.totalorder %s348_s19, %s344_s18 }
   0xd   :  { %p351_p6 = por %p350_p5, %p349_p4 }
   0xf   :  { %p352_p7 = pnand %p351_p6, %p345_p3 }
  0x11   :  { %355 = shalt.err (!%p352_p7)
}
  0x12   :  { %19 = dma.hbm_to_vmem [thread:$0]  %s488_s0, 16, %s17_s10, [#allocation3]  }
  0x13   :  { %24 = vsyncadd [#allocation6], 1920  ;;  %s407_s22 = smov [#allocation5]   ;;  %s356_s26 = scalar_lea.hbm %s489_s1, 128 }
  0x14   :  { %s25_s23 = sshll.u32 %s407_s22, 4  ;;  %p357_p8 = scmp.ne.s32.totalorder %s489_s1, %s356_s26  ;;  %s26_s23 = int_to_ptr.vmem [resolvable:$true] %s25_s23 }
  0x15   :  { %p360_p9 = scmp.lt.u32.totalorder %s356_s26, %s489_s1 }
  0x17   :  { %p362_p10 = pnand %p360_p9, %p357_p8 }
  0x19   :  { %365 = shalt.err (!%p362_p10)
}
  0x1a   :  { %s366_s3 = scalar_lea.vmem %s26_s23, 128  ;;  %s370_s0 = scalar_lea.vmem %s26_s23, 2048 }
  0x1b   :  { %p367_p11 = scmp.ne.s32.totalorder %s26_s23, %s366_s3  ;;  %p371_p12 = scmp.lt.s32.totalorder %s26_s23, %s26_s23 }
  0x1c   :  { %p372_p13 = scmp.lt.s32.totalorder %s370_s0, %s366_s3 }
  0x1e   :  { %p373_p0 = por %p372_p13, %p371_p12 }
  0x20   :  { %p374_p1 = pnand %p373_p0, %p367_p11 }
  0x22   :  { %377 = shalt.err (!%p374_p1)
}
  0x23   :  { %s408_s4 = smov 128   ;;  %s409_s5 = smov 8  }
  0x24   :  { %31 = dma.hbm_to_vmem [thread:$0]  %s489_s1, 128, %s26_s23, [#allocation6], %s408_s4, %s408_s4, %s409_s5  }
  0x25   :  { %400 = dma.done.wait [#allocation3], 16  }
  0x26   :  { %401 = vsyncadd [#allocation3], 4294967280 }
  0x27   :  { %402 = dma.done.wait [#allocation6], 2048  }
  0x28   :  { %403 = vsyncadd [#allocation6], 4294965248  ;;  %v410_v0 = vmov 0.0|0.0   ;;  %vm411_vm0 = vmmov 0   ;;  %v412_v1 = vmov 0.0   ;;  %vm55_vm1 = vcmask 261120  }
  0x29   :  { %290 = vmatprep.subr.bf16.mxu0 %v410_v0  ;;  %287 = vmatprep.mubr.msk.f32.mxu0 %vm411_vm0, %v412_v1  ;;  %v39_v2 = vld [vmem:[#allocation5] sm:$0xff]  ;;  %v40_v3 = vld [vmem:[#allocation5 + $0x8] sm:$0xff]  ;;  %vm455_vm2 = vmpackc.low %vm55_vm1, %vm55_vm1  ;;  %v187_v28 = vlaneseq  ;;  %vm191_vm4 = vcmask 1040384   ;;  %s413_s1 = smov [#allocation7]  }
  0x2a   :  { %v291_v5 = vpack.c.bf16 %v40_v3, %v39_v2  ;;  %v41_v6 = vld [vmem:[#allocation5 + $0x10] sm:$0xff]  ;;  %v42_v7 = vld [vmem:[#allocation5 + $0x18] sm:$0xff]  ;;  %v43_v9 = vld [vmem:[#allocation5 + $0x20] sm:$0xff]  ;;  %s210_s8 = sshll.u32 %s413_s1, 4  ;;  %s211_s8 = int_to_ptr.vmem [resolvable:$true] %s210_s8 }
  0x2b   :  { %v295_v8 = vpack.c.bf16 %v42_v7, %v41_v6  ;;  %v44_v10 = vld [vmem:[#allocation5 + $0x28] sm:$0xff]  ;;  %v45_v12 = vld [vmem:[#allocation5 + $0x30] sm:$0xff]  ;;  %v46_v13 = vld [vmem:[#allocation5 + $0x38] sm:$0xff]  ;;  %v188_v31 = vand.u32 127, %v187_v28  ;;  %s378_s9 = scalar_lea.vmem %s211_s8, 16  ;;  %s382_s10 = scalar_lea.vmem %s211_s8, 32 }
  0x2c   :  { %293 = vmatpush3.bf16.xpose.msk.msra.mxu0 %vm455_vm2, %v291_v5  ;;  %v299_v11 = vpack.c.bf16 %v44_v10, %v43_v9  ;;  %v303_v14 = vpack.c.bf16 %v46_v13, %v45_v12  ;;  %v47_v15 = vld [vmem:[#allocation5 + $0x40] sm:$0xff]  ;;  %v48_v16 = vld [vmem:[#allocation5 + $0x48] sm:$0xff]  ;;  %v49_v18 = vld [vmem:[#allocation5 + $0x50] sm:$0xff]  ;;  %p379_p2 = scmp.ne.s32.totalorder %s211_s8, %s378_s9  ;;  %p383_p3 = scmp.lt.s32.totalorder %s211_s8, %s211_s8 }
  0x2d   :  { %294 = vmatprep.subr.bf16.mxu0 %v410_v0  ;;  %v307_v17 = vpack.c.bf16 %v48_v16, %v47_v15  ;;  %v50_v19 = vld [vmem:[#allocation5 + $0x58] sm:$0xff]  ;;  %v51_v21 = vld [vmem:[#allocation5 + $0x60] sm:$0xff]  ;;  %v52_v22 = vld [vmem:[#allocation5 + $0x68] sm:$0xff]  ;;  %vm189_vm3 = vcmp.lt.s32.totalorder %v188_v31, 8  ;;  %p384_p4 = scmp.lt.s32.totalorder %s382_s10, %s378_s9 }
  0x2e   :  { %v311_v20 = vpack.c.bf16 %v50_v19, %v49_v18  ;;  %v315_v23 = vpack.c.bf16 %v52_v22, %v51_v21  ;;  %v53_v24 = vld [vmem:[#allocation5 + $0x70] sm:$0xff]  ;;  %v54_v25 = vld [vmem:[#allocation5 + $0x78] sm:$0xff] }
  0x2f   :  { %v319_v26 = vpack.c.bf16 %v54_v25, %v53_v24  ;;  %v38_v27 = vld [vmem:[#allocation2] sm:$0x1]  ;;  %p385_p5 = por %p384_p4, %p383_p3 }
  0x31   :  { %p386_p6 = pnand %p385_p5, %p379_p2 }
  0x34   :  { %297 = vmatpush3.bf16.xpose.msk.msra.mxu0 %vm455_vm2, %v295_v8 }
  0x35   :  { %298 = vmatprep.subr.bf16.mxu0 %v410_v0 }
  0x3c   :  { %301 = vmatpush3.bf16.xpose.msk.msra.mxu0 %vm455_vm2, %v299_v11 }
  0x3d   :  { %302 = vmatprep.subr.bf16.mxu0 %v410_v0 }
  0x44   :  { %305 = vmatpush3.bf16.xpose.msk.msra.mxu0 %vm455_vm2, %v303_v14 }
  0x45   :  { %306 = vmatprep.subr.bf16.mxu0 %v410_v0 }
  0x4c   :  { %309 = vmatpush3.bf16.xpose.msk.msra.mxu0 %vm455_vm2, %v307_v17 }
  0x4d   :  { %310 = vmatprep.subr.bf16.mxu0 %v410_v0 }
  0x54   :  { %313 = vmatpush3.bf16.xpose.msk.msra.mxu0 %vm455_vm2, %v311_v20 }
  0x55   :  { %314 = vmatprep.subr.bf16.mxu0 %v410_v0 }
  0x5c   :  { %317 = vmatpush3.bf16.xpose.msk.msra.mxu0 %vm455_vm2, %v315_v23 }
  0x5d   :  { %318 = vmatprep.subr.bf16.mxu0 %v410_v0 }
  0x64   :  { %321 = vmatpush3.bf16.xpose.msk.msra.mxu0 %vm455_vm2, %v319_v26 }
  0x6b   :  { %288 = vmatmul.mubr.msk.f32.vlgmr.msra.gmra.mrb[0].mxu0 %vm55_vm1, %v38_v27 }
 0x13e   :  { %v173_v29 = vpop.f32.mrb[0].mxu0 }
 0x13f   :  { %181 = vst [vmem:[#allocation7] sm:$0x1] %v173_v29  ;;  %v289_v30 = vpop.f32.mrb[1].mxu0 }
 0x146   :  { %v186_v32 = vld [vmem:[#allocation7] sm:$0x1] }
 0x147   :  { %v190_v33 = vsel %vm189_vm3, %v186_v32, -inf }
 0x148   :  { %v192_v34 = vsel %vm191_vm4, %v190_v33, -inf }
 0x149   :  { %193 = vmax.xlane.f32.xlu0 %v192_v34 }
 0x1d6   :  { %v194_v35 = vpop.xlane.xlu0 %193 }
 0x1d7   :  { %v195_v36 = vsub.f32 %v190_v33, %v194_v35 }
 0x1d9   :  { %v196_v37 = vmul.f32 1.442695, %v195_v36 }
 0x1db   :  { %330 = vpow2.f32 %v196_v37 }
 0x1e5   :  { %v331_v38 = vpop.eup %330 }
 0x1e6   :  { %v198_v39 = vsel %vm191_vm4, %v331_v38, 0.0 }
 0x1e7   :  { %199 = vadd.xlane.f32.xlu0 %v198_v39 }
 0x274   :  { %v200_v40 = vpop.xlane.xlu0 %199 }
 0x275   :  { %332 = vrcp.f32 %v200_v40 }
 0x27f   :  { %v333_v41 = vpop.eup %332 }
 0x280   :  { %v202_v42 = vmul.f32 %v333_v41, %v331_v38 }
 0x282   :  { %203 = vst [vmem:[#allocation7] sm:$0x1] %v202_v42 }
 0x283   :  { %389 = shalt.err (!%p386_p6)
}
 0x284   :  { %s390_s13 = scalar_lea.hbm %s490_s2, 16 }
 0x285   :  { %p391_p7 = scmp.ne.s32.totalorder %s490_s2, %s390_s13  ;;  %p394_p8 = scmp.lt.u32.totalorder %s390_s13, %s490_s2 }
 0x287   :  { %p396_p9 = pnand %p394_p8, %p391_p7 }
 0x289   :  { %399 = shalt.err (!%p396_p9)
}
 0x28a   :  { %213 = dma.vmem_to_hbm [thread:$0]  %s211_s8, 16, %s490_s2, [#allocation4]  }
 0x28b   :  { %404 = dma.done.wait [#allocation4], 16  }
 0x28c   :  { %405 = vsyncadd [#allocation4], 4294967280 }
 0x28d   :  { %217 = vsyncpa [#allocation3], 1 }
 0x28e   :  { %218 = vsyncpa [#allocation6], 1 }
 0x28f   :  { %219 = vsyncpa [#allocation4], 1 }

</bundles_post_ra>
